<compile_context>
chip_gen: v7x
topology: tpu7x:2x2x1
jax: 0.10.0
libtpu: 0.0.40
codegen_flags: <defaults>
</compile_context>

<pallas_src>
import jax
import jax.numpy as jnp
from jax.experimental import pallas as pl
from jax.experimental.pallas import tpu as pltpu

BN_EPS = 1e-5


def _non_local_kernel(params_ref, x_ref, out_ref):
    """Processes TB batch elements per grid step.

    params_ref : SMEM (5*C + 3,) f32 flat parameter vector:
                 [w_th(C) | w_ph(C) | w_g(C) | b_th, b_ph, b_g | w_out(C) | b_out(C)]
                 where w_out/b_out have eval-mode BatchNorm folded in.
    x_ref      : VMEM (TB, C, HW) f32 input block (HW lane-dense).
    out_ref    : VMEM (TB, C, HW) f32 output block, z = W_y + x.
    """
    x = x_ref[...]                                  # (TB, C, HW)
    _, n_ch, hw = x.shape
    inv_n = 1.0 / hw

    # theta/phi/g 1x1 projections as unrolled VPU MACs (no MXU for a tiny matmul).
    x0 = x[:, 0, :]                                 # (TB, HW)
    th = params_ref[0] * x0
    ph = params_ref[n_ch] * x0
    gg = params_ref[2 * n_ch] * x0
    for c in range(1, n_ch):
        xc = x[:, c, :]
        th = th + params_ref[c] * xc
        ph = ph + params_ref[n_ch + c] * xc
        gg = gg + params_ref[2 * n_ch + c] * xc
    th = th + params_ref[3 * n_ch + 0]
    ph = ph + params_ref[3 * n_ch + 1]
    gg = gg + params_ref[3 * n_ch + 2]

    # Rank-1 attention (inter_channels == 1):
    #   y = (theta @ phi^T / N) @ g  ==  theta * (phi . g) / N,  N = HW
    s = jnp.sum(ph * gg, axis=-1, keepdims=True) * inv_n        # (TB, 1)
    y = th * s                                                   # (TB, HW)

    # W (1x1 conv back to C channels, eval-mode BN folded) + residual, per channel.
    for c in range(n_ch):
        w_out_c = params_ref[3 * n_ch + 3 + c]
        b_out_c = params_ref[4 * n_ch + 3 + c]
        out_ref[:, c, :] = w_out_c * y + b_out_c + x[:, c, :]


def non_local_forward(x, w_g, b_g, w_th, b_th, w_ph, b_ph, w_W, b_W,
                      gamma, beta, rmean, rvar):
    B, C, H, W = x.shape
    HW = H * W
    # NCHW -> (B, C, HW) is a pure reshape (no transpose, no extra HBM pass).
    x_flat = x.reshape(B, C, HW).astype(jnp.float32)

    # Fold eval-mode BatchNorm into the W projection:
    #   scale = gamma / sqrt(var+eps); w' = w_W*scale; b' = (b_W - mean)*scale + beta
    # TODO(synk): BatchNorm2d folded in eval mode (running stats); train-mode batch
    # statistics are not modeled in-kernel.
    scale = gamma * jax.lax.rsqrt(rvar + BN_EPS)
    w_out = w_W.reshape(C) * scale
    b_out = (b_W - rmean) * scale + beta

    # Flat parameter vector for SMEM: scalars read in-kernel, no padded VMEM tiles.
    params = jnp.concatenate([
        w_th.reshape(C), w_ph.reshape(C), w_g.reshape(C),
        b_th.reshape(1), b_ph.reshape(1), b_g.reshape(1),
        w_out.reshape(C), b_out.reshape(C),
    ]).astype(jnp.float32)                                       # (5*C + 3,)

    # Batch tile: target ~1 MiB per grid step to amortize per-step overhead; for the
    # test shape (B=2) this yields TB=B and grid=(1,).
    bytes_per_batch = C * HW * 4
    target_bytes = 1 << 20
    tb = max(1, min(B, target_bytes // max(bytes_per_batch, 1)))
    while B % tb != 0:
        tb -= 1
    grid = (B // tb,)

    elem_bytes = 4
    bytes_accessed = 2 * B * C * HW * elem_bytes + params.size * elem_bytes
    flops = B * HW * (6 * C + 2) + B * (2 * HW + 1) + B * C * HW * 3

    out_flat = pl.pallas_call(
        _non_local_kernel,
        out_shape=jax.ShapeDtypeStruct((B, C, HW), jnp.float32),
        grid=grid,
        in_specs=[
            pl.BlockSpec(memory_space=pltpu.MemorySpace.SMEM),   # tiny param vector
            pl.BlockSpec((tb, C, HW), lambda i: (i, 0, 0)),
        ],
        out_specs=pl.BlockSpec((tb, C, HW), lambda i: (i, 0, 0)),
        compiler_params=pltpu.CompilerParams(
            dimension_semantics=("parallel",)),
        cost_estimate=pl.CostEstimate(flops=flops, transcendentals=0,
                                      bytes_accessed=bytes_accessed),
    )(params, x_flat)

    return out_flat.reshape(B, C, H, W)


def non_local_reference(x, w_g, b_g, w_th, b_th, w_ph, b_ph, w_W, b_W,
                        gamma, beta, rmean, rvar):
    """Pure-JAX reference mirroring the PyTorch forward (eval-mode BN),
    including the full (HW, HW) attention matrix."""
    B, C, H, W = x.shape
    HW = H * W
    xf = x.reshape(B, C, HW)
    g_x = jnp.einsum('oc,bcp->bop', w_g, xf) + b_g[None, :, None]       # (B,1,HW)
    th_x = jnp.einsum('oc,bcp->bop', w_th, xf) + b_th[None, :, None]
    ph_x = jnp.einsum('oc,bcp->bop', w_ph, xf) + b_ph[None, :, None]
    g_x = jnp.transpose(g_x, (0, 2, 1))                                  # (B,HW,1)
    th_x = jnp.transpose(th_x, (0, 2, 1))                                # (B,HW,1)
    f = jnp.matmul(th_x, ph_x) / HW                                      # (B,HW,HW)
    y = jnp.matmul(f, g_x)                                               # (B,HW,1)
    y = jnp.transpose(y, (0, 2, 1)).reshape(B, 1, H, W)
    wy = jnp.einsum('oc,bchw->bohw', w_W, y) + b_W[None, :, None, None]
    wy = (wy - rmean[None, :, None, None]) \
        * jax.lax.rsqrt(rvar + BN_EPS)[None, :, None, None] \
        * gamma[None, :, None, None] + beta[None, :, None, None]
    return wy + x


if __name__ == "__main__":
    B, C, H, W = 2, 4, 16, 16  # in_channels = 4, inter_channels = 1
    key = jax.random.PRNGKey(0)
    ks = jax.random.split(key, 9)
    x = jax.random.normal(ks[0], (B, C, H, W), jnp.float32)

    # Deterministic parameter init (shapes from the module's __init__, 1x1 kernels collapsed).
    w_g = 0.3 * jax.random.normal(ks[1], (1, C), jnp.float32)
    b_g = 0.1 * jax.random.normal(ks[2], (1,), jnp.float32)
    w_th = 0.3 * jax.random.normal(ks[3], (1, C), jnp.float32)
    b_th = 0.1 * jax.random.normal(ks[4], (1,), jnp.float32)
    w_ph = 0.3 * jax.random.normal(ks[5], (1, C), jnp.float32)
    b_ph = 0.1 * jax.random.normal(ks[6], (1,), jnp.float32)
    w_W = 0.3 * jax.random.normal(ks[7], (C, 1), jnp.float32)
    b_W = 0.1 * jax.random.normal(ks[8], (C,), jnp.float32)
    # BatchNorm2d(in_channels): weight/bias constant-initialized to 0 (as in the module).
    gamma = jnp.zeros((C,), jnp.float32)
    beta = jnp.zeros((C,), jnp.float32)
    rmean = jnp.zeros((C,), jnp.float32)
    rvar = jnp.ones((C,), jnp.float32)

    args = (w_g, b_g, w_th, b_th, w_ph, b_ph, w_W, b_W, gamma, beta, rmean, rvar)
    out = non_local_forward(x, *args)
    jax.block_until_ready(out)
    ref = non_local_reference(x, *args)
    assert jnp.allclose(out, ref, atol=1e-4, rtol=1e-4), "mismatch vs reference (module init)"

    # Non-trivial BN stats so the W + BN + attention path is actually exercised
    # (with the module's zero-initialized gamma/beta, W_y is identically 0).
    gamma2 = jnp.linspace(0.5, 1.5, C).astype(jnp.float32)
    beta2 = jnp.linspace(-0.2, 0.2, C).astype(jnp.float32)
    mean2 = jnp.linspace(-0.1, 0.1, C).astype(jnp.float32)
    var2 = jnp.linspace(0.8, 1.2, C).astype(jnp.float32)
    args2 = (w_g, b_g, w_th, b_th, w_ph, b_ph, w_W, b_W, gamma2, beta2, mean2, var2)
    out2 = non_local_forward(x, *args2)
    jax.block_until_ready(out2)
    ref2 = non_local_reference(x, *args2)
    assert jnp.allclose(out2, ref2, atol=1e-4, rtol=1e-4), "mismatch vs reference (BN path)"

    print("KERNEL_OK")
</pallas_src>

<mosaic_0001>
module attributes {stable_mosaic.version = 11 : i64} {
  func.func @_non_local_kernel(%arg0: i32, %arg1: memref<23xf32, #tpu.memory_space<smem>>, %arg2: memref<2x4x256xf32, #tpu.memory_space<vmem>>, %arg3: memref<2x4x256xf32, #tpu.memory_space<vmem>>) attributes {dimension_semantics = [#tpu.dimension_semantics<parallel>], iteration_bounds = array<i64: 1>, scalar_prefetch = 0 : i64, scratch_operands = 0 : i64, tpu.core_type = #tpu.core_type<tc>, window_params = [{transform_indices = @transform_0, window_bounds = array<i64: 23>}, {transform_indices = @transform_1, window_bounds = array<i64: 2, 4, 256>}, {transform_indices = @transform_2, window_bounds = array<i64: 2, 4, 256>}]} {
    %c0 = arith.constant 0 : index
    %c0_0 = arith.constant 0 : index
    %c0_1 = arith.constant 0 : index
    %0 = vector.load %arg2[%c0, %c0_0, %c0_1] : memref<2x4x256xf32, #tpu.memory_space<vmem>>, vector<2x4x256xf32>
    %1 = vector.extract_strided_slice %0 {offsets = [0, 0, 0], sizes = [2, 1, 256], strides = [1, 1, 1]} : vector<2x4x256xf32> to vector<2x1x256xf32>
    %2 = vector.shape_cast %1 : vector<2x1x256xf32> to vector<2x256xf32>
    %c0_2 = arith.constant 0 : index
    %3 = memref.load %arg1[%c0_2] : memref<23xf32, #tpu.memory_space<smem>>
    %4 = vector.broadcast %3 : f32 to vector<2x256xf32>
    %5 = arith.mulf %4, %2 : vector<2x256xf32>
    %c4 = arith.constant 4 : index
    %6 = memref.load %arg1[%c4] : memref<23xf32, #tpu.memory_space<smem>>
    %7 = vector.broadcast %6 : f32 to vector<2x256xf32>
    %8 = arith.mulf %7, %2 : vector<2x256xf32>
    %c8 = arith.constant 8 : index
    %9 = memref.load %arg1[%c8] : memref<23xf32, #tpu.memory_space<smem>>
    %10 = vector.broadcast %9 : f32 to vector<2x256xf32>
    %11 = arith.mulf %10, %2 : vector<2x256xf32>
    %12 = vector.extract_strided_slice %0 {offsets = [0, 1, 0], sizes = [2, 1, 256], strides = [1, 1, 1]} : vector<2x4x256xf32> to vector<2x1x256xf32>
    %13 = vector.shape_cast %12 : vector<2x1x256xf32> to vector<2x256xf32>
    %c1 = arith.constant 1 : index
    %14 = memref.load %arg1[%c1] : memref<23xf32, #tpu.memory_space<smem>>
    %15 = vector.broadcast %14 : f32 to vector<2x256xf32>
    %16 = arith.mulf %15, %13 : vector<2x256xf32>
    %17 = arith.addf %5, %16 : vector<2x256xf32>
    %c5 = arith.constant 5 : index
    %18 = memref.load %arg1[%c5] : memref<23xf32, #tpu.memory_space<smem>>
    %19 = vector.broadcast %18 : f32 to vector<2x256xf32>
    %20 = arith.mulf %19, %13 : vector<2x256xf32>
    %21 = arith.addf %8, %20 : vector<2x256xf32>
    %c9 = arith.constant 9 : index
    %22 = memref.load %arg1[%c9] : memref<23xf32, #tpu.memory_space<smem>>
    %23 = vector.broadcast %22 : f32 to vector<2x256xf32>
    %24 = arith.mulf %23, %13 : vector<2x256xf32>
    %25 = arith.addf %11, %24 : vector<2x256xf32>
    %26 = vector.extract_strided_slice %0 {offsets = [0, 2, 0], sizes = [2, 1, 256], strides = [1, 1, 1]} : vector<2x4x256xf32> to vector<2x1x256xf32>
    %27 = vector.shape_cast %26 : vector<2x1x256xf32> to vector<2x256xf32>
    %c2 = arith.constant 2 : index
    %28 = memref.load %arg1[%c2] : memref<23xf32, #tpu.memory_space<smem>>
    %29 = vector.broadcast %28 : f32 to vector<2x256xf32>
    %30 = arith.mulf %29, %27 : vector<2x256xf32>
    %31 = arith.addf %17, %30 : vector<2x256xf32>
    %c6 = arith.constant 6 : index
    %32 = memref.load %arg1[%c6] : memref<23xf32, #tpu.memory_space<smem>>
    %33 = vector.broadcast %32 : f32 to vector<2x256xf32>
    %34 = arith.mulf %33, %27 : vector<2x256xf32>
    %35 = arith.addf %21, %34 : vector<2x256xf32>
    %c10 = arith.constant 10 : index
    %36 = memref.load %arg1[%c10] : memref<23xf32, #tpu.memory_space<smem>>
    %37 = vector.broadcast %36 : f32 to vector<2x256xf32>
    %38 = arith.mulf %37, %27 : vector<2x256xf32>
    %39 = arith.addf %25, %38 : vector<2x256xf32>
    %40 = vector.extract_strided_slice %0 {offsets = [0, 3, 0], sizes = [2, 1, 256], strides = [1, 1, 1]} : vector<2x4x256xf32> to vector<2x1x256xf32>
    %41 = vector.shape_cast %40 : vector<2x1x256xf32> to vector<2x256xf32>
    %c3 = arith.constant 3 : index
    %42 = memref.load %arg1[%c3] : memref<23xf32, #tpu.memory_space<smem>>
    %43 = vector.broadcast %42 : f32 to vector<2x256xf32>
    %44 = arith.mulf %43, %41 : vector<2x256xf32>
    %45 = arith.addf %31, %44 : vector<2x256xf32>
    %c7 = arith.constant 7 : index
    %46 = memref.load %arg1[%c7] : memref<23xf32, #tpu.memory_space<smem>>
    %47 = vector.broadcast %46 : f32 to vector<2x256xf32>
    %48 = arith.mulf %47, %41 : vector<2x256xf32>
    %49 = arith.addf %35, %48 : vector<2x256xf32>
    %c11 = arith.constant 11 : index
    %50 = memref.load %arg1[%c11] : memref<23xf32, #tpu.memory_space<smem>>
    %51 = vector.broadcast %50 : f32 to vector<2x256xf32>
    %52 = arith.mulf %51, %41 : vector<2x256xf32>
    %53 = arith.addf %39, %52 : vector<2x256xf32>
    %c12 = arith.constant 12 : index
    %54 = memref.load %arg1[%c12] : memref<23xf32, #tpu.memory_space<smem>>
    %55 = vector.broadcast %54 : f32 to vector<2x256xf32>
    %56 = arith.addf %45, %55 : vector<2x256xf32>
    %c13 = arith.constant 13 : index
    %57 = memref.load %arg1[%c13] : memref<23xf32, #tpu.memory_space<smem>>
    %58 = vector.broadcast %57 : f32 to vector<2x256xf32>
    %59 = arith.addf %49, %58 : vector<2x256xf32>
    %c14 = arith.constant 14 : index
    %60 = memref.load %arg1[%c14] : memref<23xf32, #tpu.memory_space<smem>>
    %61 = vector.broadcast %60 : f32 to vector<2x256xf32>
    %62 = arith.addf %53, %61 : vector<2x256xf32>
    %63 = arith.mulf %59, %62 : vector<2x256xf32>
    %cst = arith.constant dense<0.000000e+00> : vector<2xf32>
    %64 = vector.multi_reduction <add>, %63, %cst [1] : vector<2x256xf32> to vector<2xf32>
    %65 = vector.shape_cast %64 : vector<2xf32> to vector<2x1xf32>
    %cst_3 = arith.constant 3.906250e-03 : f32
    %66 = vector.broadcast %cst_3 : f32 to vector<2x1xf32>
    %67 = arith.mulf %65, %66 : vector<2x1xf32>
    %68 = vector.broadcast %67 : vector<2x1xf32> to vector<2x256xf32>
    %69 = arith.mulf %56, %68 : vector<2x256xf32>
    %c15 = arith.constant 15 : index
    %70 = memref.load %arg1[%c15] : memref<23xf32, #tpu.memory_space<smem>>
    %c19 = arith.constant 19 : index
    %71 = memref.load %arg1[%c19] : memref<23xf32, #tpu.memory_space<smem>>
    %72 = vector.broadcast %70 : f32 to vector<2x256xf32>
    %73 = arith.mulf %72, %69 : vector<2x256xf32>
    %74 = vector.broadcast %71 : f32 to vector<2x256xf32>
    %75 = arith.addf %73, %74 : vector<2x256xf32>
    %76 = vector.extract_strided_slice %0 {offsets = [0, 0, 0], sizes = [2, 1, 256], strides = [1, 1, 1]} : vector<2x4x256xf32> to vector<2x1x256xf32>
    %77 = vector.shape_cast %76 : vector<2x1x256xf32> to vector<2x256xf32>
    %78 = arith.addf %75, %77 : vector<2x256xf32>
    %c0_4 = arith.constant 0 : index
    %c0_5 = arith.constant 0 : index
    %c0_6 = arith.constant 0 : index
    %79 = vector.load %arg3[%c0_4, %c0_5, %c0_6] : memref<2x4x256xf32, #tpu.memory_space<vmem>>, vector<2x1x256xf32>
    %80 = vector.shape_cast %79 : vector<2x1x256xf32> to vector<2x256xf32>
    %81 = vector.shape_cast %78 : vector<2x256xf32> to vector<2x1x256xf32>
    tpu.vector_store %arg3[%c0_4, %c0_5, %c0_6], %81 {strides = array<i32>} : memref<2x4x256xf32, #tpu.memory_space<vmem>>, vector<2x1x256xf32>,
    %c16 = arith.constant 16 : index
    %82 = memref.load %arg1[%c16] : memref<23xf32, #tpu.memory_space<smem>>
    %c20 = arith.constant 20 : index
    %83 = memref.load %arg1[%c20] : memref<23xf32, #tpu.memory_space<smem>>
    %84 = vector.broadcast %82 : f32 to vector<2x256xf32>
    %85 = arith.mulf %84, %69 : vector<2x256xf32>
    %86 = vector.broadcast %83 : f32 to vector<2x256xf32>
    %87 = arith.addf %85, %86 : vector<2x256xf32>
    %88 = vector.extract_strided_slice %0 {offsets = [0, 1, 0], sizes = [2, 1, 256], strides = [1, 1, 1]} : vector<2x4x256xf32> to vector<2x1x256xf32>
    %89 = vector.shape_cast %88 : vector<2x1x256xf32> to vector<2x256xf32>
    %90 = arith.addf %87, %89 : vector<2x256xf32>
    %c0_7 = arith.constant 0 : index
    %c1_8 = arith.constant 1 : index
    %c0_9 = arith.constant 0 : index
    %91 = vector.load %arg3[%c0_7, %c1_8, %c0_9] : memref<2x4x256xf32, #tpu.memory_space<vmem>>, vector<2x1x256xf32>
    %92 = vector.shape_cast %91 : vector<2x1x256xf32> to vector<2x256xf32>
    %93 = vector.shape_cast %90 : vector<2x256xf32> to vector<2x1x256xf32>
    tpu.vector_store %arg3[%c0_7, %c1_8, %c0_9], %93 {strides = array<i32>} : memref<2x4x256xf32, #tpu.memory_space<vmem>>, vector<2x1x256xf32>,
    %c17 = arith.constant 17 : index
    %94 = memref.load %arg1[%c17] : memref<23xf32, #tpu.memory_space<smem>>
    %c21 = arith.constant 21 : index
    %95 = memref.load %arg1[%c21] : memref<23xf32, #tpu.memory_space<smem>>
    %96 = vector.broadcast %94 : f32 to vector<2x256xf32>
    %97 = arith.mulf %96, %69 : vector<2x256xf32>
    %98 = vector.broadcast %95 : f32 to vector<2x256xf32>
    %99 = arith.addf %97, %98 : vector<2x256xf32>
    %100 = vector.extract_strided_slice %0 {offsets = [0, 2, 0], sizes = [2, 1, 256], strides = [1, 1, 1]} : vector<2x4x256xf32> to vector<2x1x256xf32>
    %101 = vector.shape_cast %100 : vector<2x1x256xf32> to vector<2x256xf32>
    %102 = arith.addf %99, %101 : vector<2x256xf32>
    %c0_10 = arith.constant 0 : index
    %c2_11 = arith.constant 2 : index
    %c0_12 = arith.constant 0 : index
    %103 = vector.load %arg3[%c0_10, %c2_11, %c0_12] : memref<2x4x256xf32, #tpu.memory_space<vmem>>, vector<2x1x256xf32>
    %104 = vector.shape_cast %103 : vector<2x1x256xf32> to vector<2x256xf32>
    %105 = vector.shape_cast %102 : vector<2x256xf32> to vector<2x1x256xf32>
    tpu.vector_store %arg3[%c0_10, %c2_11, %c0_12], %105 {strides = array<i32>} : memref<2x4x256xf32, #tpu.memory_space<vmem>>, vector<2x1x256xf32>,
    %c18 = arith.constant 18 : index
    %106 = memref.load %arg1[%c18] : memref<23xf32, #tpu.memory_space<smem>>
    %c22 = arith.constant 22 : index
    %107 = memref.load %arg1[%c22] : memref<23xf32, #tpu.memory_space<smem>>
    %108 = vector.broadcast %106 : f32 to vector<2x256xf32>
    %109 = arith.mulf %108, %69 : vector<2x256xf32>
    %110 = vector.broadcast %107 : f32 to vector<2x256xf32>
    %111 = arith.addf %109, %110 : vector<2x256xf32>
    %112 = vector.extract_strided_slice %0 {offsets = [0, 3, 0], sizes = [2, 1, 256], strides = [1, 1, 1]} : vector<2x4x256xf32> to vector<2x1x256xf32>
    %113 = vector.shape_cast %112 : vector<2x1x256xf32> to vector<2x256xf32>
    %114 = arith.addf %111, %113 : vector<2x256xf32>
    %c0_13 = arith.constant 0 : index
    %c3_14 = arith.constant 3 : index
    %c0_15 = arith.constant 0 : index
    %115 = vector.load %arg3[%c0_13, %c3_14, %c0_15] : memref<2x4x256xf32, #tpu.memory_space<vmem>>, vector<2x1x256xf32>
    %116 = vector.shape_cast %115 : vector<2x1x256xf32> to vector<2x256xf32>
    %117 = vector.shape_cast %114 : vector<2x256xf32> to vector<2x1x256xf32>
    tpu.vector_store %arg3[%c0_13, %c3_14, %c0_15], %117 {strides = array<i32>} : memref<2x4x256xf32, #tpu.memory_space<vmem>>, vector<2x1x256xf32>,
    return
  }
  func.func @transform_0(%arg0: i32) -> i32 {
    %c0_i32 = arith.constant 0 : i32
    %c0_i32_0 = arith.constant 0 : i32
    return %c0_i32 : i32
  }
  func.func @transform_1(%arg0: i32) -> (i32, i32, i32) {
    %c0_i32 = arith.constant 0 : i32
    %c0_i32_0 = arith.constant 0 : i32
    %c0_i32_1 = arith.constant 0 : i32
    return %arg0, %c0_i32, %c0_i32_0 : i32, i32, i32
  }
  func.func @transform_2(%arg0: i32) -> (i32, i32, i32) {
    %c0_i32 = arith.constant 0 : i32
    %c0_i32_0 = arith.constant 0 : i32
    %c0_i32_1 = arith.constant 0 : i32
    return %arg0, %c0_i32, %c0_i32_0 : i32, i32, i32
  }
}

</mosaic_0001>

<bundles_post_ra>
// kernel: tpu_custom_call.1
= control target key start
LH: loop header
LB: loop body
LE: loop exit
PB: predicated region body
PF: predicated region fallthrough
CT: control target
= control target key end

     0   :  { %7 = vsyncpa [#allocation5], 0  ;;  %s739_s0 = inlined_call_operand.hbm [shape: f32[23], index: 0, kind: input, shape index: {}]   ;;  %s740_s1 = inlined_call_operand.hbm [shape: f32[2,4,256], index: 1, kind: input, shape index: {}]   ;;  %s741_s2 = inlined_call_operand.hbm [shape: f32[2,4,256], index: 2, kind: output, shape index: {}]  }
   0x1   :  { %8 = vsyncpa [#allocation3], 0 }
   0x2   :  { %9 = vsyncpa [#allocation4], 0  ;;  %s512_s11 = scalar_lea.hbm %s739_s0, 16 }
   0x3   :  { %p513_p0 = scmp.ne.s32.totalorder %s739_s0, %s512_s11  ;;  %p516_p1 = scmp.lt.u32.totalorder %s512_s11, %s739_s0 }
   0x5   :  { %p518_p2 = pnand %p516_p1, %p513_p0 }
   0x7   :  { %521 = shalt.err (!%p518_p2)
}
   0x8   :  { %s572_s16 = smov [#allocation2]   ;;  %s573_s19 = smov [#allocation6]  }
   0x9   :  { %17 = dma.hbm_to_smem %s739_s0, 16, %s572_s16, [#allocation5]  }
   0xa   :  { %s23_s20 = sshll.u32 %s573_s19, 4  ;;  %s522_s23 = scalar_lea.hbm %s740_s1, 256  ;;  %s24_s20 = int_to_ptr.vmem [resolvable:$true] %s23_s20 }
   0xb   :  { %p523_p3 = scmp.ne.s32.totalorder %s740_s1, %s522_s23  ;;  %p526_p4 = scmp.lt.u32.totalorder %s522_s23, %s740_s1 }
   0xd   :  { %p528_p5 = pnand %p526_p4, %p523_p3 }
   0xf   :  { %531 = shalt.err (!%p528_p5)
}
  0x10   :  { %s532_s28 = scalar_lea.vmem %s24_s20, 256  ;;  %p537_p7 = scmp.lt.s32.totalorder %s24_s20, %s24_s20 }
  0x11   :  { %p533_p6 = scmp.ne.s32.totalorder %s24_s20, %s532_s28  ;;  %p538_p8 = scmp.lt.s32.totalorder %s532_s28, %s532_s28 }
  0x13   :  { %p539_p9 = por %p538_p8, %p537_p7 }
  0x15   :  { %p540_p10 = pnand %p539_p9, %p533_p6 }
  0x17   :  { %543 = shalt.err (!%p540_p10)
}
  0x18   :  { %s574_s0 = smov 128   ;;  %s575_s29 = smov 8  }
  0x19   :  { %29 = dma.hbm_to_vmem [thread:$0]  %s740_s1, 256, %s24_s20, [#allocation3], %s574_s0, %s574_s0, %s575_s29  }
  0x1a   :  { %566 = dma.done.wait [#allocation5], 16  }
  0x1b   :  { %567 = vsyncadd [#allocation5], 4294967280 }
  0x1c   :  { %568 = dma.done.wait [#allocation3], 256  }
  0x1d   :  { %569 = vsyncadd [#allocation3], 4294967040 }
  0x1e   :  { %36 = sfence }
  0x1f   :  { %s459_s4 = sld [smem:[#allocation2 + $0x4]]  ;;  %s460_s5 = sld [smem:[#allocation2 + $0x8]]  ;;  %v621_v0 = vld [vmem:[#allocation6] sm:$0xff]  ;;  %v623_v1 = vld [vmem:[#allocation6 + $0x8] sm:$0xff]  ;;  %v193_v28 = vlaneseq  ;;  %vm209_vm0 = vcmask 1041409   ;;  %vm214_vm1 = vcmask 1041408  }
  0x20   :  { %s464_s6 = sld [smem:[#allocation2 + $0x5]]  ;;  %s467_s7 = sld [smem:[#allocation2 + $0x9]] }
  0x21   :  { %s473_s8 = sld [smem:[#allocation2 + $0x6]]  ;;  %s625_s9 = sld [smem:[#allocation2 + $0xa]]  ;;  %v655_v45 = vshrl.u32 %v193_v28, 7  ;;  %vm700_vm2 = vcmp.lt.s32.totalorder %v193_v28, 256 }
  0x22   :  { %s627_s1 = sld [smem:[#allocation2 + $0x7]]  ;;  %s633_s10 = sld [smem:[#allocation2 + $0xb]] }
  0x23   :  { %s643_s11 = sld [smem:[#allocation2 + $0xd]]  ;;  %s645_s12 = sld [smem:[#allocation2 + $0xe]]  ;;  %v195_v58 = vsub.s32 0, %v655_v45  ;;  %v199_v59 = vsub.s32 4, %v655_v45 }
  0x24   :  { %s461_s13 = sld [smem:[#allocation2 + $0x1]]  ;;  %s39_s14 = sld [smem:[#allocation2]] }
  0x25   :  { %v44_v2 = vstv %s459_s4  ;;  %v48_v5 = vstv %s460_s5  ;;  %s470_s15 = sld [smem:[#allocation2 + $0x2]]  ;;  %s479_s16 = sld [smem:[#allocation2 + $0x3]] }
  0x26   :  { %v66_v3 = vstv %s464_s6  ;;  %v80_v4 = vstv %s467_s7  ;;  %v45_v10 = vmul.f32 %v44_v2, %v621_v0  ;;  %v46_v11 = vmul.f32 %v44_v2, %v623_v1  ;;  %s488_s17 = sld [smem:[#allocation2 + $0xc]]  ;;  %s669_s18 = sld [smem:[#allocation2 + $0xf]] }
  0x27   :  { %v67_v6 = vmul.f32 %v66_v3, %v621_v0  ;;  %v68_v7 = vmul.f32 %v66_v3, %v623_v1  ;;  %v81_v8 = vmul.f32 %v80_v4, %v621_v0  ;;  %v82_v9 = vmul.f32 %v80_v4, %v623_v1  ;;  %s671_s19 = sld [smem:[#allocation2 + $0x10]]  ;;  %s673_s20 = sld [smem:[#allocation2 + $0x11]] }
  0x28   :  { %v108_v14 = vstv %s473_s8  ;;  %v49_v15 = vmul.f32 %v48_v5, %v621_v0  ;;  %v50_v17 = vmul.f32 %v48_v5, %v623_v1  ;;  %v122_v23 = vstv %s625_s9  ;;  %s675_s21 = sld [smem:[#allocation2 + $0x12]]  ;;  %s677_s22 = sld [smem:[#allocation2 + $0x13]] }
  0x29   :  { %v465_v12 = vrot.slane %v67_v6, 9  ;;  %v466_v13 = vrot.slane %v68_v7, 9  ;;  %v468_v16 = vrot.slane %v81_v8, 9  ;;  %v469_v18 = vrot.slane %v82_v9, 9  ;;  %s679_s23 = sld [smem:[#allocation2 + $0x14]]  ;;  %s681_s24 = sld [smem:[#allocation2 + $0x15]] }
  0x2a   :  { %v109_v21 = vmul.f32 %v108_v14, %v621_v0  ;;  %v110_v22 = vmul.f32 %v108_v14, %v623_v1  ;;  %v150_v24 = vstv %s627_s1  ;;  %v123_v30 = vmul.f32 %v122_v23, %v621_v0  ;;  %s683_s25 = sld [smem:[#allocation2 + $0x16]]  ;;  %s578_s26 = smov [#allocation7]  }
  0x2b   :  { %v77_v19 = vadd.f32 %v465_v12, %v45_v10  ;;  %v78_v20 = vadd.f32 %v466_v13, %v46_v11  ;;  %v91_v25 = vadd.f32 %v468_v16, %v49_v15  ;;  %v92_v29 = vadd.f32 %v469_v18, %v50_v17  ;;  %s446_s27 = sshll.u32 %s578_s26, 4  ;;  %s447_s27 = int_to_ptr.vmem [resolvable:$true] %s446_s27 }
  0x2c   :  { %v474_v26 = vrot.slane %v109_v21, 10  ;;  %v475_v27 = vrot.slane %v110_v22, 10  ;;  %v124_v31 = vmul.f32 %v122_v23, %v623_v1  ;;  %v164_v32 = vstv %s633_s10  ;;  %s544_s28 = scalar_lea.vmem %s447_s27, 256  ;;  %p549_p12 = scmp.lt.s32.totalorder %s447_s27, %s447_s27 }
  0x2d   :  { %v151_v35 = vmul.f32 %v150_v24, %v621_v0  ;;  %v152_v36 = vmul.f32 %v150_v24, %v623_v1  ;;  %v477_v37 = vrot.slane %v123_v30, 10  ;;  %v165_v41 = vmul.f32 %v164_v32, %v621_v0  ;;  %p545_p11 = scmp.ne.s32.totalorder %s447_s27, %s544_s28  ;;  %p550_p13 = scmp.lt.s32.totalorder %s544_s28, %s544_s28 }
  0x2e   :  { %v119_v33 = vadd.f32 %v474_v26, %v77_v19  ;;  %v120_v34 = vadd.f32 %v475_v27, %v78_v20  ;;  %v478_v38 = vrot.slane %v124_v31, 10  ;;  %v166_v42 = vmul.f32 %v164_v32, %v623_v1 }
  0x2f   :  { %v483_v39 = vrot.slane %v151_v35, 11  ;;  %v484_v40 = vrot.slane %v152_v36, 11  ;;  %v133_v43 = vadd.f32 %v477_v37, %v91_v25  ;;  %v486_v48 = vrot.slane %v165_v41, 11  ;;  %p551_p0 = por %p550_p13, %p549_p12 }
  0x30   :  { %v134_v44 = vadd.f32 %v478_v38, %v92_v29  ;;  %v487_v49 = vrot.slane %v166_v42, 11  ;;  %v182_v50 = vstv %s643_s11  ;;  %v186_v51 = vstv %s645_s12 }
  0x31   :  { %v161_v46 = vadd.f32 %v483_v39, %v119_v33  ;;  %v162_v47 = vadd.f32 %v484_v40, %v120_v34  ;;  %v175_v52 = vadd.f32 %v486_v48, %v133_v43  ;;  %v52_v9 = vstv %s461_s13  ;;  %p552_p1 = pnand %p551_p0, %p545_p11 }
  0x32   :  { %v176_v53 = vadd.f32 %v487_v49, %v134_v44  ;;  %v53_v10 = vmul.f32 %v52_v9, %v621_v0  ;;  %v40_v11 = vstv %s39_s14  ;;  %v54_v12 = vmul.f32 %v52_v9, %v623_v1 }
  0x33   :  { %v183_v54 = vadd.f32 %v182_v50, %v161_v46  ;;  %v184_v55 = vadd.f32 %v182_v50, %v162_v47  ;;  %v187_v56 = vadd.f32 %v186_v51, %v175_v52  ;;  %v94_v13 = vstv %s470_s15 }
  0x34   :  { %v188_v57 = vadd.f32 %v186_v51, %v176_v53  ;;  %v41_v14 = vmul.f32 %v40_v11, %v621_v0  ;;  %v462_v15 = vrot.slane %v53_v10, 9  ;;  %v95_v16 = vmul.f32 %v94_v13, %v621_v0 }
  0x35   :  { %v189_v60 = vmul.f32 %v187_v56, %v183_v54  ;;  %v42_v17 = vmul.f32 %v40_v11, %v623_v1  ;;  %v463_v18 = vrot.slane %v54_v12, 9  ;;  %v96_v19 = vmul.f32 %v94_v13, %v623_v1 }
  0x36   :  { %v190_v61 = vmul.f32 %v188_v57, %v184_v55  ;;  %v136_v20 = vstv %s479_s16  ;;  %v63_v21 = vadd.f32 %v462_v15, %v41_v14  ;;  %v471_v22 = vrot.slane %v95_v16, 10 }
  0x37   :  { %v196_v62 = vrot.slane %v189_v60, %v195_v58  ;;  %v200_v63 = vrot.slane %v189_v60, %v199_v59  ;;  %v137_v23 = vmul.f32 %v136_v20, %v621_v0  ;;  %v64_v24 = vadd.f32 %v463_v18, %v42_v17 }
  0x38   :  { %v204_v2 = vrot.slane %v190_v61, %v195_v58  ;;  %v208_v3 = vrot.slane %v190_v61, %v199_v59  ;;  %v472_v25 = vrot.slane %v96_v19, 10  ;;  %v138_v26 = vmul.f32 %v136_v20, %v623_v1 }
  0x39   :  { %v576_v27 = vmov 839922192   ;;  %v105_v30 = vadd.f32 %v471_v22, %v63_v21  ;;  %v480_v31 = vrot.slane %v137_v23, 11  ;;  %v178_v37 = vstv %s488_s17 }
  0x3a   :  { %v210_v4 = vsel %vm209_vm0, %v204_v2, %v196_v62  ;;  %v211_v5 = vsel %vm209_vm0, %v208_v3, %v200_v63  ;;  %v223_v29 = vunpack.c.l.s4 %v576_v27  ;;  %v106_v32 = vadd.f32 %v472_v25, %v64_v24 }
  0x3b   :  { %v215_v6 = vsel %vm214_vm1, %v210_v4, 0.0  ;;  %v216_v7 = vsel %vm214_vm1, %v211_v5, 0.0  ;;  %v481_v33 = vrot.slane %v138_v26, 11  ;;  %v147_v35 = vadd.f32 %v480_v31, %v105_v30 }
  0x3c   :  { %v217_v8 = vadd.f32 %v216_v7, %v215_v6  ;;  %v224_v34 = vunpack.c.0.s8 %v223_v29  ;;  %v577_v38 = vmov 1966171168   ;;  %v236_v48 = vstv %s669_s18 }
  0x3d   :  { %v148_v36 = vadd.f32 %v481_v33, %v106_v32  ;;  %v247_v39 = vunpack.c.l.s4 %v577_v38  ;;  %v179_v42 = vadd.f32 %v178_v37, %v147_v35  ;;  %v285_v49 = vstv %s671_s19 }
  0x3e   :  { %218 = vadd.xlane.f32.xlu0 %v217_v8  ;;  %v227_v40 = vsub.s32 %v224_v34, %v655_v45  ;;  %v339_v50 = vstv %s673_s20  ;;  %v239_v51 = vstv %s677_s22  ;;  %v288_v52 = vstv %s679_s23 }
  0x3f   :  { %v180_v44 = vadd.f32 %v178_v37, %v148_v36  ;;  %v248_v46 = vunpack.c.0.s8 %v247_v39  ;;  %v495_v53 = vrot.slane %v621_v0, 9  ;;  %v391_v54 = vstv %s675_s21 }
  0x40   :  { %v342_v57 = vstv %s681_s24  ;;  %v394_v58 = vstv %s683_s25  ;;  %v496_v60 = vrot.slane %v623_v1, 9  ;;  %v499_v61 = vrot.slane %v621_v0, 10 }
  0x41   :  { %v251_v59 = vsub.s32 %v248_v46, %v655_v45  ;;  %v503_v62 = vrot.slane %v621_v0, 11  ;;  %v500_v6 = vrot.slane %v623_v1, 10  ;;  %v504_v45 = vrot.slane %v623_v1, 11 }
  0xcb   :  { %v219_v41 = vpop.xlane.xlu0 %218 }
  0xcc   :  { %v220_v43 = vmul.f32 0.00390625, %v219_v41 }
  0xce   :  { %v228_v47 = vrot.slane %v220_v43, %v227_v40 }
  0xd0   :  { %v229_v55 = vrot.slane %v228_v47, 1  ;;  %v232_v56 = vmul.f32 %v228_v47, %v179_v42 }
  0xd2   :  { %v233_v63 = vmul.f32 %v229_v55, %v180_v44  ;;  %v237_v2 = vmul.f32 %v236_v48, %v232_v56  ;;  %v286_v3 = vmul.f32 %v285_v49, %v232_v56  ;;  %v340_v4 = vmul.f32 %v339_v50, %v232_v56 }
  0xd3   :  { %v392_v7 = vmul.f32 %v391_v54, %v232_v56 }
  0xd4   :  { %v238_v8 = vmul.f32 %v236_v48, %v233_v63  ;;  %v240_v9 = vadd.f32 %v239_v51, %v237_v2  ;;  %v287_v10 = vmul.f32 %v285_v49, %v233_v63  ;;  %v289_v11 = vadd.f32 %v288_v52, %v286_v3 }
  0xd5   :  { %v341_v12 = vmul.f32 %v339_v50, %v233_v63  ;;  %v343_v13 = vadd.f32 %v342_v57, %v340_v4  ;;  %v393_v14 = vmul.f32 %v391_v54, %v233_v63  ;;  %v395_v15 = vadd.f32 %v394_v58, %v392_v7 }
  0xd6   :  { %v241_v16 = vadd.f32 %v239_v51, %v238_v8  ;;  %v242_v17 = vadd.f32 %v240_v9, %v621_v0  ;;  %v290_v28 = vadd.f32 %v288_v52, %v287_v10  ;;  %v299_v18 = vadd.f32 %v495_v53, %v289_v11 }
  0xd7   :  { %v344_v19 = vadd.f32 %v342_v57, %v341_v12  ;;  %v351_v20 = vadd.f32 %v499_v61, %v343_v13  ;;  %v396_v21 = vadd.f32 %v394_v58, %v393_v14  ;;  %v403_v22 = vadd.f32 %v503_v62, %v395_v15 }
  0xd8   :  { %v243_v23 = vadd.f32 %v241_v16, %v623_v1  ;;  %v252_v24 = vrot.slane %v242_v17, %v251_v59  ;;  %v300_v25 = vadd.f32 %v496_v60, %v290_v28  ;;  %v309_v26 = vrot.slane %v299_v18, %v251_v59 }
  0xd9   :  { %v352_v27 = vadd.f32 %v500_v6, %v344_v19  ;;  %v361_v29 = vrot.slane %v351_v20, %v251_v59  ;;  %v404_v30 = vadd.f32 %v504_v45, %v396_v21  ;;  %v413_v31 = vrot.slane %v403_v22, %v251_v59 }
  0xda   :  { %v259_v32 = vrot.slane %v252_v24, %v251_v59  ;;  %v266_v33 = vrot.slane %v243_v23, %v251_v59  ;;  %v316_v34 = vrot.slane %v309_v26, %v251_v59  ;;  %v323_v35 = vrot.slane %v300_v25, %v251_v59 }
  0xdb   :  { %v368_v0 = vrot.slane %v361_v29, %v251_v59  ;;  %v375_v36 = vrot.slane %v352_v27, %v251_v59  ;;  %v420_v37 = vrot.slane %v413_v31, %v251_v59  ;;  %v427_v38 = vrot.slane %v404_v30, %v251_v59 }
  0xdc   :  { %v273_v39 = vrot.slane %v266_v33, %v251_v59  ;;  %280 = vst.msk [vmem:[#allocation7] ss:$4 sm:$0x3] %vm700_vm2, %v259_v32  ;;  %v330_v1 = vrot.slane %v323_v35, %v251_v59  ;;  %334 = vst.msk [vmem:[#allocation7 + $0x1] ss:$4 sm:$0x3] %vm700_vm2, %v316_v34 }
  0xdd   :  { %v382_v40 = vrot.slane %v375_v36, %v251_v59  ;;  %386 = vst.msk [vmem:[#allocation7 + $0x2] ss:$4 sm:$0x3] %vm700_vm2, %v368_v0  ;;  %v434_v41 = vrot.slane %v427_v38, %v251_v59  ;;  %438 = vst.msk [vmem:[#allocation7 + $0x3] ss:$4 sm:$0x3] %vm700_vm2, %v420_v37 }
  0xde   :  { %282 = vst.msk [vmem:[#allocation7 + $0x8] ss:$4 sm:$0x3] %vm700_vm2, %v273_v39  ;;  %336 = vst.msk [vmem:[#allocation7 + $0x9] ss:$4 sm:$0x3] %vm700_vm2, %v330_v1 }
  0xdf   :  { %388 = vst.msk [vmem:[#allocation7 + $0xa] ss:$4 sm:$0x3] %vm700_vm2, %v382_v40  ;;  %440 = vst.msk [vmem:[#allocation7 + $0xb] ss:$4 sm:$0x3] %vm700_vm2, %v434_v41 }
  0xe0   :  { %555 = shalt.err (!%p552_p1)
}
  0xe1   :  { %s556_s4 = scalar_lea.hbm %s741_s2, 256 }
  0xe2   :  { %p557_p2 = scmp.ne.s32.totalorder %s741_s2, %s556_s4  ;;  %p560_p3 = scmp.lt.u32.totalorder %s556_s4, %s741_s2 }
  0xe4   :  { %p562_p4 = pnand %p560_p3, %p557_p2 }
  0xe6   :  { %565 = shalt.err (!%p562_p4)
}
  0xe7   :  { %452 = dma.vmem_to_hbm [thread:$0]  %s447_s27, 256, %s741_s2, [#allocation4], %s574_s0, %s574_s0, %s575_s29  }
  0xe8   :  { %570 = dma.done.wait [#allocation4], 256  }
  0xe9   :  { %571 = vsyncadd [#allocation4], 4294967040 }
  0xea   :  { %456 = vsyncpa [#allocation3], 1 }
  0xeb   :  { %457 = vsyncpa [#allocation4], 1 }
  0xec   :  { %458 = vsyncpa [#allocation5], 1 }

</bundles_post_ra>
